<compile_context>
chip_gen: v6e
topology: v6e:2x2x1
jax: 0.10.0
libtpu: 0.0.40
codegen_flags: <defaults>
</compile_context>

<pallas_src>
import functools

import jax
import jax.numpy as jnp
from jax.experimental import pallas as pl
from jax.experimental.pallas import tpu as pltpu


def _use_bf16_epilogue() -> bool:
    """bf16 bias+ReLU epilogue on chips with a bf16 VPU (v6e/v7x); f32 else."""
    try:
        kind = jax.devices()[0].device_kind.lower()
    except Exception:  # pragma: no cover - defensive; f32 path is always safe
        return False
    return ("v6" in kind) or ("v7" in kind)


def _pick_tile_b(B: int) -> int:
    """Pick the batch tile.

    Goals: (a) divide B, (b) multiple of 8 sublanes, (c) large (<=1024 rows)
    to amortize per-grid-step overhead, (d) leave >=2 grid steps when B allows
    so the "parallel" batch axis can split across both v7x TensorCores.
    """
    assert B % 8 == 0, "batch must be a multiple of 8 sublanes"
    if B <= 512:
        # Small batch: 2 parallel steps if cleanly divisible, else one tile.
        if B >= 256 and (B // 2) % 8 == 0:
            return B // 2
        return B
    for cand in (1024, 896, 768, 640, 512, 384, 256, 128, 64, 32, 16, 8):
        if cand <= B and B % cand == 0 and (B // cand) >= 2:
            return cand
    return B


def mlp_kernel(x_ref, w1_ref, b1_ref, w2_ref, b2_ref, o_ref, *, bf16_epilogue):
    # Hidden layer: ReLU(x @ W1 + b1).  bf16 operands, f32 MXU accumulation.
    h = jnp.dot(x_ref[...], w1_ref[...], preferred_element_type=jnp.float32)
    if bf16_epilogue:
        # v6e/v7x: bf16 VPU; the (tile_b, H) intermediate is cast to bf16 for
        # the second matmul anyway, so do bias+ReLU in bf16 (halves vreg traffic).
        h = jnp.maximum(h.astype(jnp.bfloat16) + b1_ref[...].astype(jnp.bfloat16),
                        0.0)
    else:
        # v5e: no bf16 VPU -> keep the epilogue in f32, cast only for the MXU.
        h = jnp.maximum(h + b1_ref[...], 0.0).astype(w2_ref.dtype)
    # Output layer: h @ W2 + b2, f32 accumulation, store in o_ref's dtype (bf16).
    out = jnp.dot(h, w2_ref[...], preferred_element_type=jnp.float32)
    o_ref[...] = (out + b2_ref[...]).astype(o_ref.dtype)


def model_forward(x, w1, b1, w2, b2, *, tile_b=None, out_dtype=jnp.bfloat16):
    """Pallas equivalent of Model(net)(x) where net = Linear->ReLU->Linear."""
    B, D_in = x.shape
    H = w1.shape[1]
    D_out = w2.shape[1]

    if tile_b is None:
        tile_b = _pick_tile_b(B)
    tile_b = min(tile_b, B)
    assert B % tile_b == 0 and tile_b % 8 == 0, (
        "batch tile must divide B and be a multiple of 8 sublanes")
    assert D_in % 128 == 0 and H % 128 == 0 and D_out % 128 == 0, (
        "feature dims must be lane-aligned (multiples of 128)")

    n_steps = B // tile_b
    bf16_epilogue = _use_bf16_epilogue()
    out_itemsize = jnp.dtype(out_dtype).itemsize

    # Advisory cost estimate so XLA can overlap surrounding ops.
    flops = 2 * B * (D_in * H + H * D_out)
    bytes_accessed = (
        x.size * x.dtype.itemsize
        + w1.size * w1.dtype.itemsize + b1.size * b1.dtype.itemsize
        + w2.size * w2.dtype.itemsize + b2.size * b2.dtype.itemsize
        + B * D_out * out_itemsize)
    cost = pl.CostEstimate(flops=flops, transcendentals=0,
                           bytes_accessed=bytes_accessed)

    # VMEM budget: double-buffered x/out tiles + (double-buffered) resident
    # weights, with 2x headroom; clamped so we never request beyond v7x's
    # 64 MiB physical VMEM nor below the 32 MiB default scoped limit.
    weight_bytes = (w1.size * w1.dtype.itemsize + b1.size * b1.dtype.itemsize
                    + w2.size * w2.dtype.itemsize + b2.size * b2.dtype.itemsize)
    tile_bytes = tile_b * D_in * x.dtype.itemsize + tile_b * D_out * out_itemsize
    vmem_need = 2 * (tile_bytes + weight_bytes)
    vmem_limit = int(min(64 * 1024 * 1024, max(32 * 1024 * 1024, 2 * vmem_need)))

    kernel = functools.partial(mlp_kernel, bf16_epilogue=bf16_epilogue)

    return pl.pallas_call(
        kernel,
        out_shape=jax.ShapeDtypeStruct((B, D_out), out_dtype),
        grid=(n_steps,),
        in_specs=[
            pl.BlockSpec((tile_b, D_in), lambda i: (i, 0)),   # x: streamed per tile
            pl.BlockSpec((D_in, H),      lambda i: (0, 0)),   # W1: resident
            pl.BlockSpec((1, H),         lambda i: (0, 0)),   # b1: resident
            pl.BlockSpec((H, D_out),     lambda i: (0, 0)),   # W2: resident
            pl.BlockSpec((1, D_out),     lambda i: (0, 0)),   # b2: resident
        ],
        out_specs=pl.BlockSpec((tile_b, D_out), lambda i: (i, 0)),
        compiler_params=pltpu.CompilerParams(
            dimension_semantics=("parallel",),
            vmem_limit_bytes=vmem_limit),
        cost_estimate=cost,
    )(x, w1, b1, w2, b2)


def reference_forward(x, w1, b1, w2, b2, *, bf16_epilogue, out_dtype):
    # Mirrors the kernel math: bf16 MXU inputs, f32 accumulation, chip-matched
    # epilogue precision, bf16 output.
    h = jnp.dot(x, w1, preferred_element_type=jnp.float32)
    if bf16_epilogue:
        h = jnp.maximum(h.astype(jnp.bfloat16) + b1.astype(jnp.bfloat16), 0.0)
    else:
        h = jnp.maximum(h + b1, 0.0).astype(w2.dtype)
    out = jnp.dot(h, w2, preferred_element_type=jnp.float32)
    return (out + b2).astype(out_dtype)


if __name__ == "__main__":
    # MXU/lane-aligned sizes: B=256 -> tile_b=128, 2 parallel grid steps
    # (exercises the megacore-parallel batch axis); feature dims multiples of
    # 128 for lane-dense I/O.
    B, D_in, H, D_out = 256, 256, 512, 128

    key = jax.random.PRNGKey(0)
    kx, k1, k2, k3, k4 = jax.random.split(key, 5)

    # Deterministic synthetic inputs / parameters (bf16 operands, f32 biases).
    x = jax.random.normal(kx, (B, D_in), dtype=jnp.float32).astype(jnp.bfloat16)
    w1 = (jax.random.normal(k1, (D_in, H), dtype=jnp.float32) * 0.05).astype(jnp.bfloat16)
    b1 = jax.random.normal(k2, (1, H), dtype=jnp.float32) * 0.05
    w2 = (jax.random.normal(k3, (H, D_out), dtype=jnp.float32) * 0.05).astype(jnp.bfloat16)
    b2 = jax.random.normal(k4, (1, D_out), dtype=jnp.float32) * 0.05

    out = jax.block_until_ready(model_forward(x, w1, b1, w2, b2))

    ref = reference_forward(x, w1, b1, w2, b2,
                            bf16_epilogue=_use_bf16_epilogue(),
                            out_dtype=jnp.bfloat16)
    assert out.shape == (B, D_out)
    assert out.dtype == jnp.bfloat16
    assert jnp.allclose(out.astype(jnp.float32), ref.astype(jnp.float32),
                        atol=3e-2, rtol=3e-2), "mismatch vs reference"

    print("KERNEL_OK")
</pallas_src>

<mosaic_0001>
module attributes {stable_mosaic.version = 11 : i64} {
  func.func @mlp_kernel(%arg0: i32, %arg1: memref<128x256xbf16, #tpu.memory_space<vmem>>, %arg2: memref<256x512xbf16, #tpu.memory_space<vmem>>, %arg3: memref<1x512xf32, #tpu.memory_space<vmem>>, %arg4: memref<512x128xbf16, #tpu.memory_space<vmem>>, %arg5: memref<1x128xf32, #tpu.memory_space<vmem>>, %arg6: memref<128x128xbf16, #tpu.memory_space<vmem>>) attributes {dimension_semantics = [#tpu.dimension_semantics<parallel>], iteration_bounds = array<i64: 2>, scalar_prefetch = 0 : i64, scratch_operands = 0 : i64, tpu.core_type = #tpu.core_type<tc>, window_params = [{transform_indices = @transform_0, window_bounds = array<i64: 128, 256>}, {pipeline_mode = #tpu.pipeline_mode<synchronous>, transform_indices = @transform_1, window_bounds = array<i64: 256, 512>}, {pipeline_mode = #tpu.pipeline_mode<synchronous>, transform_indices = @transform_2, window_bounds = array<i64: 1, 512>}, {pipeline_mode = #tpu.pipeline_mode<synchronous>, transform_indices = @transform_3, window_bounds = array<i64: 512, 128>}, {pipeline_mode = #tpu.pipeline_mode<synchronous>, transform_indices = @transform_4, window_bounds = array<i64: 1, 128>}, {transform_indices = @transform_5, window_bounds = array<i64: 128, 128>}]} {
    %c0 = arith.constant 0 : index
    %c0_0 = arith.constant 0 : index
    %0 = vector.load %arg1[%c0, %c0_0] : memref<128x256xbf16, #tpu.memory_space<vmem>>, vector<128x256xbf16>
    %c0_1 = arith.constant 0 : index
    %c0_2 = arith.constant 0 : index
    %1 = vector.load %arg2[%c0_1, %c0_2] : memref<256x512xbf16, #tpu.memory_space<vmem>>, vector<256x512xbf16>
    %cst = arith.constant dense<0.000000e+00> : vector<128x512xf32>
    %2 = tpu.matmul %0, %1, %cst {dimension_numbers = #tpu.dot_dimension_numbers<[1], [0], [0], [1], [0, 0, 1, 1], [], []>} : vector<128x256xbf16>, vector<256x512xbf16>, vector<128x512xf32> -> vector<128x512xf32>
    %c0_3 = arith.constant 0 : index
    %c0_4 = arith.constant 0 : index
    %3 = vector.load %arg3[%c0_3, %c0_4] : memref<1x512xf32, #tpu.memory_space<vmem>>, vector<1x512xf32>
    %4 = vector.broadcast %3 : vector<1x512xf32> to vector<128x512xf32>
    %5 = arith.addf %2, %4 : vector<128x512xf32>
    %cst_5 = arith.constant 0.000000e+00 : f32
    %6 = vector.broadcast %cst_5 : f32 to vector<128x512xf32>
    %7 = arith.maximumf %5, %6 : vector<128x512xf32>
    %8 = arith.truncf %7 : vector<128x512xf32> to vector<128x512xbf16>
    %c0_6 = arith.constant 0 : index
    %c0_7 = arith.constant 0 : index
    %9 = vector.load %arg4[%c0_6, %c0_7] : memref<512x128xbf16, #tpu.memory_space<vmem>>, vector<512x128xbf16>
    %cst_8 = arith.constant dense<0.000000e+00> : vector<128x128xf32>
    %10 = tpu.matmul %8, %9, %cst_8 {dimension_numbers = #tpu.dot_dimension_numbers<[1], [0], [0], [1], [0, 0, 1, 1], [], []>} : vector<128x512xbf16>, vector<512x128xbf16>, vector<128x128xf32> -> vector<128x128xf32>
    %c0_9 = arith.constant 0 : index
    %c0_10 = arith.constant 0 : index
    %11 = vector.load %arg5[%c0_9, %c0_10] : memref<1x128xf32, #tpu.memory_space<vmem>>, vector<1x128xf32>
    %12 = vector.broadcast %11 : vector<1x128xf32> to vector<128x128xf32>
    %13 = arith.addf %10, %12 : vector<128x128xf32>
    %14 = arith.truncf %13 : vector<128x128xf32> to vector<128x128xbf16>
    %c0_11 = arith.constant 0 : index
    %c0_12 = arith.constant 0 : index
    %15 = vector.load %arg6[%c0_11, %c0_12] : memref<128x128xbf16, #tpu.memory_space<vmem>>, vector<128x128xbf16>
    tpu.vector_store %arg6[%c0_11, %c0_12], %14 {strides = array<i32>} : memref<128x128xbf16, #tpu.memory_space<vmem>>, vector<128x128xbf16>,
    return
  }
  func.func @transform_0(%arg0: i32) -> (i32, i32) {
    %c0_i32 = arith.constant 0 : i32
    %c0_i32_0 = arith.constant 0 : i32
    return %arg0, %c0_i32 : i32, i32
  }
  func.func @transform_1(%arg0: i32) -> (i32, i32) {
    %c0_i32 = arith.constant 0 : i32
    %c0_i32_0 = arith.constant 0 : i32
    %c0_i32_1 = arith.constant 0 : i32
    return %c0_i32, %c0_i32_0 : i32, i32
  }
  func.func @transform_2(%arg0: i32) -> (i32, i32) {
    %c0_i32 = arith.constant 0 : i32
    %c0_i32_0 = arith.constant 0 : i32
    %c0_i32_1 = arith.constant 0 : i32
    return %c0_i32, %c0_i32_0 : i32, i32
  }
  func.func @transform_3(%arg0: i32) -> (i32, i32) {
    %c0_i32 = arith.constant 0 : i32
    %c0_i32_0 = arith.constant 0 : i32
    %c0_i32_1 = arith.constant 0 : i32
    return %c0_i32, %c0_i32_0 : i32, i32
  }
  func.func @transform_4(%arg0: i32) -> (i32, i32) {
    %c0_i32 = arith.constant 0 : i32
    %c0_i32_0 = arith.constant 0 : i32
    %c0_i32_1 = arith.constant 0 : i32
    return %c0_i32, %c0_i32_0 : i32, i32
  }
  func.func @transform_5(%arg0: i32) -> (i32, i32) {
    %c0_i32 = arith.constant 0 : i32
    %c0_i32_0 = arith.constant 0 : i32
    return %arg0, %c0_i32 : i32, i32
  }
}

</mosaic_0001>

<bundles_post_ra>
// kernel: tpu_custom_call.1
= control target key start
LH: loop header
LB: loop body
LE: loop exit
PB: predicated region body
PF: predicated region fallthrough
CT: control target
= control target key end

     0   :  { %10 = vsyncpa [#allocation3], 0  ;;  %s2893_s0 = inlined_call_operand.hbm [shape: bf16[256,256], index: 0, kind: input, shape index: {}]   ;;  %s2894_s1 = inlined_call_operand.hbm [shape: bf16[256,512], index: 1, kind: input, shape index: {}]   ;;  %s2895_s2 = inlined_call_operand.hbm [shape: f32[1,512], index: 2, kind: input, shape index: {}]   ;;  %s2896_s3 = inlined_call_operand.hbm [shape: bf16[512,128], index: 3, kind: input, shape index: {}]   ;;  %s2897_s4 = inlined_call_operand.vmem [shape: f32[1,128], index: 4, kind: input, shape index: {}]   ;;  %s2898_s5 = inlined_call_operand.hbm [shape: bf16[256,128], index: 5, kind: output, shape index: {}]  }
   0x1   :  { %12 = vsyncpa [#allocation3 + $0x1], 0 }
   0x2   :  { %13 = vsyncpa [#allocation6], 0 }
   0x3   :  { %14 = vsyncpa [#allocation9], 0 }
   0x4   :  { %15 = vsyncpa [#allocation4], 0 }
   0x5   :  { %17 = vsyncpa [#allocation4 + $0x1], 0  ;;  %s2570_s18 = smov 0   ;;  %s2572_s19 = smov 0  }
   0x6   :  { %s2574_s20 = smov 0   ;;  %s2576_s21 = smov 0  }
   0x7 LB: > { %s2591_s22 = sadd.s32 4294967295, %s2525_s21   ;;  %s1766_s23 = sadd.s32 4294967294, %s2525_s21   ;;  %s2525_s21 = sphi %s2576_s21, %s2922_s21   ;;  %s2521_s20 = sphi %s2574_s20, %s2921_s20   ;;  %s2517_s19 = sphi %s2572_s19, %s2920_s19   ;;  %s2513_s18 = sphi %s2570_s18, %s2919_s18  }
   0x8   : > { %p43_p0 = scmp.ne.s32.totalorder %s2517_s19, %s2513_s18  ;;  %p2899_p1 = scmp.eq.s32.totalorder %s2591_s22, 0 }
   0x9   : > { %p157_p3 = scmp.eq.s32.totalorder %s1766_s23, 1  ;;  %p1767_p5 = scmp.ge.s32.totalorder %s2525_s21, 1 }
   0xa   : > { %p2600_p4 = por %p2899_p1, %p43_p0  ;;  %p164_p7 = scmp.lt.s32.totalorder %s2525_s21, 3 }
   0xb   : > { %p2605_p6 = por %p157_p3, %p43_p0  ;;  %s2527_s27 = smov [#allocation5]  }
   0xc   : > { %s2903_s24 = scalar_select %p2600_p4, 1, 0 }
   0xd   : > { %s2904_s25 = scalar_select %p2605_p6, 1, 0 }
   0xe   : > { %p2610_p8 = pnand %p1767_p5, %p164_p7  ;;  %s176_s28 = sshll.u32 %s2527_s27, 4  ;;  %s177_s28 = int_to_ptr.vmem [resolvable:$true] %s176_s28 }
   0xf   : > { %s2528_s30 = smov [#allocation7]   ;;  %s2529_s7 = smov [#allocation8]  }
  0x10   : > { %s2905_s26 = scalar_select %p2610_p8, 1, 0 }
  0x11   : > { %p2126_p9 = pneg %p2610_p8  ;;  %s190_s6 = sshll.u32 %s2528_s30, 4  ;;  %s191_s6 = int_to_ptr.vmem [resolvable:$true] %s190_s6 }
  0x12   : > { %s200_s8 = sshll.u32 %s2529_s7, 4  ;;  %s2358_s9 = scalar_lea.vmem %s177_s28, 8192  ;;  %s201_s8 = int_to_ptr.vmem [resolvable:$true] %s200_s8 }
  0x13   : > { %p2619_p11 = pnand %p2126_p9, %p2899_p1  ;;  %p2359_p13 = scmp.ne.s32.totalorder %s177_s28, %s2358_s9 }
  0x14   : > { %p2366_p5 = scmp.lt.s32.totalorder %s177_s28, %s177_s28  ;;  %p2367_p7 = scmp.lt.s32.totalorder %s2358_s9, %s2358_s9 }
  0x15   : > { %p2349_p12 = pneg %p2619_p11 }
  0x16   : > { %p2368_p9 = por %p2367_p7, %p2366_p5 }
  0x17   : > { %p2361_p0 = pnand %p2359_p13, %p2349_p12 }
  0x19   : > { %p2362_p3 = pneg %p2361_p0 }
  0x1b   : > { %p2369_p10 = pnand %p2368_p9, %p2362_p3 }
  0x1d   : > { %2372 = shalt.err (!%p2369_p10)
}
  0x1e   : > { %s2530_s10 = smov 256   ;;  %s2531_s11 = smov 16  }
  0x1f   : > { %2129 = dma.hbm_to_vmem [thread:$0]  (!%p2619_p11), %s2894_s1, 8192, %s177_s28, [#allocation6], %s2530_s10, %s2530_s10, %s2531_s11  }
  0x20   : > { %s2384_s14 = scalar_lea.vmem %s191_s6, 64  ;;  %p2392_p2 = scmp.lt.s32.totalorder %s191_s6, %s191_s6 }
  0x21   : > { %p2385_p1 = scmp.ne.s32.totalorder %s191_s6, %s2384_s14  ;;  %p2393_p6 = scmp.lt.s32.totalorder %s2384_s14, %s2384_s14 }
  0x23   : > { %p2387_p13 = pnand %p2385_p1, %p2349_p12  ;;  %p2394_p5 = por %p2393_p6, %p2392_p2 }
  0x25   : > { %p2388_p0 = pneg %p2387_p13 }
  0x27   : > { %p2395_p3 = pnand %p2394_p5, %p2388_p0 }
  0x29   : > { %2398 = shalt.err (!%p2395_p3)
}
  0x2a   : > { %2132 = dma.hbm_to_vmem [thread:$0]  (!%p2619_p11), %s2895_s2, 64, %s191_s6, [#allocation6]  }
  0x2b   : > { %s2410_s17 = scalar_lea.vmem %s201_s8, 4096  ;;  %p2418_p9 = scmp.lt.s32.totalorder %s201_s8, %s201_s8 }
  0x2c   : > { %p2411_p10 = scmp.ne.s32.totalorder %s201_s8, %s2410_s17  ;;  %p2419_p13 = scmp.lt.s32.totalorder %s2410_s17, %s2410_s17 }
  0x2e   : > { %p2413_p7 = pnand %p2411_p10, %p2349_p12  ;;  %p2420_p4 = por %p2419_p13, %p2418_p9 }
  0x30   : > { %p2414_p1 = pneg %p2413_p7 }
  0x32   : > { %p2421_p2 = pnand %p2420_p4, %p2414_p1 }
  0x34   : > { %2424 = shalt.err (!%p2421_p2)
}
  0x35   : > { %s2532_s23 = smov 64   ;;  %s2533_s27 = smov 4  }
  0x36   : > { %2135 = dma.hbm_to_vmem [thread:$0]  (!%p2619_p11), %s2896_s3, 4096, %s201_s8, [#allocation9], %s2532_s23, %s2532_s23, %s2533_s27  }
  0x37   : > { %s2650_s6 = sadd.s32 1, %s2525_s21   ;;  %s30_s9 = sadd.s32 1, %s2521_s20 }
  0x38   : > { %s27_s7 = ssub.s32 %s2525_s21, %s2650_s6  ;;  %p37_p6 = scmp.ne.s32.totalorder %s2521_s20, %s2517_s19 }
  0x39   : > { %p28_p4 = scmp.eq.s32.totalorder %s27_s7, 0  ;;  %p38_p12 = scmp.eq.s32.totalorder %s2525_s21, 0 }
  0x3a   : > { %p2147_p0 = scmp.lt.s32.totalorder %s2525_s21, 2  ;;  %p2907_p3 = scmp.eq.s32.totalorder %s2591_s22, 1 }
  0x3b   : > { %s2660_s10 = scalar_select %p28_p4, %s2521_s20, %s30_s9  }
  0x3c   : > { %p39_p5 = por %p38_p12, %p37_p6  ;;  %p2664_p10 = por %p2907_p3, %p37_p6 }
  0x3d   : > { %s217_s29 = sand.u32 1, %s2521_s20   ;;  %s1917_s12 = sshll.u32 %s2525_s21, 11 }
  0x3e   : > { %s2908_s11 = scalar_select %p2664_p10, 1, 0 }
  0x3f   : > { %s1772_s8 = sshll.u32 %s217_s29, 7  ;;  %s2673_s15 = scalar_lea.hbm %s2893_s0, %s1917_s12 }
  0x40   : > { %s221_s16 = scalar_lea.vmem [#allocation2], %s1772_s8  ;;  %p2675_p11 = pnand %p2147_p0, %p39_p5 }
  0x41   : > { %s229_s17 = sshll.u32 %s221_s16, 4  ;;  %s2681_s27 = scalar_lea.sflag [#allocation3], %s217_s29  ;;  %s2679_s17 = int_to_ptr.vmem [resolvable:$true] %s229_s17 }
  0x42   : > { %s2425_s28 = scalar_lea.hbm %s2673_s15, 2048  ;;  %p2427_p1 = pneg %p2675_p11 }
  0x43   : > { %p2426_p7 = scmp.ne.s32.totalorder %s2673_s15, %s2425_s28  ;;  %s2430_s9 = scalar_lea.hbm %s2893_s0, 4096 }
  0x44   : > { %p2431_p2 = scmp.lt.s32.totalorder %s2673_s15, %s2893_s0  ;;  %p2432_p4 = scmp.lt.s32.totalorder %s2430_s9, %s2425_s28 }
  0x45   : > { %p2428_p9 = pnand %p2427_p1, %p2426_p7 }
  0x46   : > { %p2433_p6 = por %p2432_p4, %p2431_p2 }
  0x47   : > { %p2429_p13 = pneg %p2428_p9 }
  0x49   : > { %p2434_p12 = pnand %p2433_p6, %p2429_p13 }
  0x4b   : > { %2437 = shalt.err (!%p2434_p12)
}
  0x4c   : > { %s2438_s29 = scalar_lea.vmem %s2679_s17, 2048  ;;  %s2534_s13 = smov [#allocation2]  }
  0x4d   : > { %p2439_p0 = scmp.ne.s32.totalorder %s2679_s17, %s2438_s29  ;;  %s2443_s14 = sshll.u32 %s2534_s13, 4  ;;  %s2444_s14 = int_to_ptr.vmem [resolvable:$false] %s2443_s14 }
  0x4e   : > { %s2445_s16 = scalar_lea.vmem %s2444_s14, 4096  ;;  %p2446_p7 = scmp.lt.s32.totalorder %s2679_s17, %s2444_s14 }
  0x4f   : > { %p2441_p5 = pnand %p2439_p0, %p2427_p1  ;;  %p2447_p9 = scmp.lt.s32.totalorder %s2445_s16, %s2438_s29 }
  0x51   : > { %p2442_p3 = pneg %p2441_p5  ;;  %p2448_p10 = por %p2447_p9, %p2446_p7 }
  0x53   : > { %p2449_p8 = pnand %p2448_p10, %p2442_p3 }
  0x55   : > { %2452 = shalt.err (!%p2449_p8)
}
  0x56   : > { %s2535_s28 = smov 128   ;;  %s2536_s30 = smov 8  }
  0x57   : > { %2139 = dma.hbm_to_vmem [thread:$0]  (!%p2675_p11), %s2673_s15, 2048, %s2679_s17, %s2681_s27, %s2535_s28, %s2535_s28, %s2536_s30  }
  0x58   : > { %p2910_p1 = scmp.ne.s32.totalorder %s2905_s26, 0 }
  0x59   : > { %s2705_s7 = sand.u32 (!%p2910_p1), 1, %s2517_s19   ;;  %p2911_p8 = scmp.ne.s32.totalorder (!%p2910_p1), %s2903_s24, 0 }
  0x5a   : > { %241 = sbr.rel (%p2910_p1) target bundleno = 650 (0x28a), region = 40  ;;  %s1777_s9 = sshll.u32 (!%p2910_p1), %s2705_s7, 7 }
  0x5b   : > { %s244_s12 = scalar_lea.sflag (!%p2910_p1), [#allocation3], %s2705_s7  ;;  %s2709_s8 = scalar_lea.vmem (!%p2910_p1), [#allocation2], %s1777_s9 }
  0x5f   : > { %2496 = dma.done.wait (%p2911_p8), %s244_s12, 2048  }
  0x60   : > { %2498 = vsyncadd (%p2911_p8), %s244_s12, 4294965248  ;;  %p2912_p10 = scmp.eq.s32.totalorder %s2591_s22, 0 }
  0x62   : > { %2500 = dma.done.wait (%p2912_p10), [#allocation6], 8256   ;;  %p2913_p11 = pmov %p2912_p10 }
  0x63   : > { %p2914_p13 = pmov %p2912_p10 }
  0x64   : > { %2502 = vsyncadd (%p2913_p11), [#allocation6], 4294959040 }
  0x65   : > { %2504 = dma.done.wait (%p2914_p13), [#allocation9], 4096   ;;  %p2915_p2 = pmov %p2912_p10 }
  0x66   : > { %v2195_v0 = vld [vmem:[#allocation5 + $0xe4] ss:$16 sps:$4 sm:$0xff]   ;;  %v2197_v1 = vld [vmem:[#allocation5 + $0xec] ss:$16 sps:$4 sm:$0xff]   ;;  %v2199_v2 = vld [vmem:[#allocation5 + $0xe0] ss:$16 sps:$4 sm:$0xff]  }
  0x67   : > { %2506 = vsyncadd (%p2915_p2), [#allocation9], 4294963200  ;;  %791 = vmatprep.subr.bf16.mxu0 %v2195_v0  ;;  %v2200_v3 = vld [vmem:[#allocation5 + $0xe8] ss:$16 sps:$4 sm:$0xff]   ;;  %904 = vmatprep.subr.bf16.mxu1 %v2197_v1  ;;  %v2201_v4 = vld [vmem:[#allocation5 + $0xc4] ss:$16 sps:$4 sm:$0xff]  }
  0x68   : > { %792 = vmatpush1.bf16.msra.mxu0 %v2199_v2  ;;  %905 = vmatpush1.bf16.msra.mxu1 %v2200_v3  ;;  %v2203_v5 = vld [vmem:[#allocation5 + $0xcc] ss:$16 sps:$4 sm:$0xff]   ;;  %v2205_v6 = vld [vmem:[#allocation5 + $0xc0] ss:$16 sps:$4 sm:$0xff]   ;;  %v2206_v7 = vld [vmem:[#allocation5 + $0xc8] ss:$16 sps:$4 sm:$0xff]  }
  0x69   : > { %793 = vmatprep.subr.bf16.mxu0 %v2201_v4  ;;  %906 = vmatprep.subr.bf16.mxu1 %v2203_v5  ;;  %v2207_v8 = vld [vmem:[#allocation5 + $0xa4] ss:$16 sps:$4 sm:$0xff]   ;;  %v2209_v9 = vld [vmem:[#allocation5 + $0xac] ss:$16 sps:$4 sm:$0xff]   ;;  %v2211_v10 = vld [vmem:[#allocation5 + $0xa0] ss:$16 sps:$4 sm:$0xff]  }
  0x6a   : > { %v2212_v11 = vld [vmem:[#allocation5 + $0xa8] ss:$16 sps:$4 sm:$0xff]   ;;  %v2213_v12 = vld [vmem:[#allocation5 + $0x84] ss:$16 sps:$4 sm:$0xff]   ;;  %v2215_v13 = vld [vmem:[#allocation5 + $0x8c] ss:$16 sps:$4 sm:$0xff]  }
  0x6b   : > { %v2217_v14 = vld [vmem:[#allocation5 + $0x80] ss:$16 sps:$4 sm:$0xff]   ;;  %v2218_v15 = vld [vmem:[#allocation5 + $0x88] ss:$16 sps:$4 sm:$0xff]   ;;  %v2219_v16 = vld [vmem:[#allocation5 + $0x64] ss:$16 sps:$4 sm:$0xff]  }
  0x6c   : > { %794 = vmatpush1.bf16.msra.mxu0 %v2205_v6  ;;  %907 = vmatpush1.bf16.msra.mxu1 %v2206_v7  ;;  %v2221_v17 = vld [vmem:[#allocation5 + $0x6c] ss:$16 sps:$4 sm:$0xff]   ;;  %v2223_v18 = vld [vmem:[#allocation5 + $0x60] ss:$16 sps:$4 sm:$0xff]   ;;  %v2224_v19 = vld [vmem:[#allocation5 + $0x68] ss:$16 sps:$4 sm:$0xff]  }
  0x6d   : > { %795 = vmatprep.subr.bf16.mxu0 %v2207_v8  ;;  %908 = vmatprep.subr.bf16.mxu1 %v2209_v9  ;;  %v2225_v20 = vld [vmem:[#allocation5 + $0x44] ss:$16 sps:$4 sm:$0xff]   ;;  %v2227_v21 = vld [vmem:[#allocation5 + $0x4c] ss:$16 sps:$4 sm:$0xff]   ;;  %v2229_v22 = vld [vmem:[#allocation5 + $0x40] ss:$16 sps:$4 sm:$0xff]  }
  0x6e   : > { %v2230_v23 = vld [vmem:[#allocation5 + $0x48] ss:$16 sps:$4 sm:$0xff]   ;;  %v2231_v24 = vld [vmem:[#allocation5 + $0x24] ss:$16 sps:$4 sm:$0xff]   ;;  %v2233_v25 = vld [vmem:[#allocation5 + $0x2c] ss:$16 sps:$4 sm:$0xff]  }
  0x6f   : > { %v2235_v26 = vld [vmem:[#allocation5 + $0x20] ss:$16 sps:$4 sm:$0xff]   ;;  %v2236_v27 = vld [vmem:[#allocation5 + $0x28] ss:$16 sps:$4 sm:$0xff]   ;;  %v2237_v28 = vld [vmem:[#allocation5 + $0x4] ss:$16 sps:$4 sm:$0xff]  }
  0x70   : > { %796 = vmatpush1.bf16.msra.mxu0 %v2211_v10  ;;  %909 = vmatpush1.bf16.msra.mxu1 %v2212_v11  ;;  %v2239_v29 = vld [vmem:[#allocation5 + $0xc] ss:$16 sps:$4 sm:$0xff]   ;;  %v2241_v30 = vld [vmem:[#allocation5] ss:$16 sps:$4 sm:$0xff]   ;;  %v2242_v31 = vld [vmem:[#allocation5 + $0x8] ss:$16 sps:$4 sm:$0xff]  }
  0x71   : > { %797 = vmatprep.subr.bf16.mxu0 %v2213_v12  ;;  %910 = vmatprep.subr.bf16.mxu1 %v2215_v13  ;;  %v2243_v32 = vld [vmem:[#allocation5 + $0x1e4] ss:$16 sps:$4 sm:$0xff]   ;;  %v2245_v33 = vld [vmem:[#allocation5 + $0x1ec] ss:$16 sps:$4 sm:$0xff]   ;;  %v2247_v34 = vld [vmem:[#allocation5 + $0x1e0] ss:$16 sps:$4 sm:$0xff]  }
  0x72   : > { %v2248_v35 = vld [vmem:[#allocation5 + $0x1e8] ss:$16 sps:$4 sm:$0xff]   ;;  %v2249_v36 = vld [vmem:[#allocation5 + $0x1c4] ss:$16 sps:$4 sm:$0xff]   ;;  %v2251_v37 = vld [vmem:[#allocation5 + $0x1cc] ss:$16 sps:$4 sm:$0xff]  }
  0x73   : > { %v2253_v38 = vld [vmem:[#allocation5 + $0x1c0] ss:$16 sps:$4 sm:$0xff]   ;;  %v2254_v39 = vld [vmem:[#allocation5 + $0x1c8] ss:$16 sps:$4 sm:$0xff]   ;;  %v2255_v40 = vld [vmem:[#allocation5 + $0x1a4] ss:$16 sps:$4 sm:$0xff]  }
  0x74   : > { %798 = vmatpush1.bf16.msra.mxu0 %v2217_v14  ;;  %911 = vmatpush1.bf16.msra.mxu1 %v2218_v15  ;;  %v2257_v41 = vld [vmem:[#allocation5 + $0x1ac] ss:$16 sps:$4 sm:$0xff]   ;;  %v2259_v42 = vld [vmem:[#allocation5 + $0x1a0] ss:$16 sps:$4 sm:$0xff]   ;;  %v2260_v43 = vld [vmem:[#allocation5 + $0x1a8] ss:$16 sps:$4 sm:$0xff]  }
  0x75   : > { %799 = vmatprep.subr.bf16.mxu0 %v2219_v16  ;;  %912 = vmatprep.subr.bf16.mxu1 %v2221_v17  ;;  %v2261_v44 = vld [vmem:[#allocation5 + $0x184] ss:$16 sps:$4 sm:$0xff]   ;;  %v2263_v45 = vld [vmem:[#allocation5 + $0x18c] ss:$16 sps:$4 sm:$0xff]   ;;  %v2265_v46 = vld [vmem:[#allocation5 + $0x180] ss:$16 sps:$4 sm:$0xff]  }
  0x76   : > { %v2266_v47 = vld [vmem:[#allocation5 + $0x188] ss:$16 sps:$4 sm:$0xff]   ;;  %v2293_v48 = vld [vmem:[%s2709_s8 + $0x4] ss:$8 sps:$4 sm:$0xff]   ;;  %v2271_v51 = vld [vmem:[#allocation5 + $0x160] ss:$16 sps:$4 sm:$0xff]  }
  0x77   : > { %v2267_v49 = vld [vmem:[#allocation5 + $0x164] ss:$16 sps:$4 sm:$0xff]   ;;  %v2269_v50 = vld [vmem:[#allocation5 + $0x16c] ss:$16 sps:$4 sm:$0xff]   ;;  %823 = vmatprep.mubr.bf16.mxu0 %v2293_v48  ;;  %936 = vmatprep.mubr.bf16.mxu1 %v2293_v48  ;;  %v2272_v52 = vld [vmem:[#allocation5 + $0x168] ss:$16 sps:$4 sm:$0xff]   ;;  %v371_v48 = vlaneseq }
  0x78   : > { %800 = vmatpush1.bf16.msra.mxu0 %v2223_v18  ;;  %913 = vmatpush1.bf16.msra.mxu1 %v2224_v19  ;;  %v2273_v53 = vld [vmem:[#allocation5 + $0x144] ss:$16 sps:$4 sm:$0xff]   ;;  %v2275_v54 = vld [vmem:[#allocation5 + $0x14c] ss:$16 sps:$4 sm:$0xff]   ;;  %v2277_v55 = vld [vmem:[#allocation5 + $0x140] ss:$16 sps:$4 sm:$0xff]  }
  0x79   : > { %801 = vmatprep.subr.bf16.mxu0 %v2225_v20  ;;  %914 = vmatprep.subr.bf16.mxu1 %v2227_v21  ;;  %v2278_v56 = vld [vmem:[#allocation5 + $0x148] ss:$16 sps:$4 sm:$0xff]   ;;  %v2279_v57 = vld [vmem:[#allocation5 + $0x124] ss:$16 sps:$4 sm:$0xff]   ;;  %v2281_v58 = vld [vmem:[#allocation5 + $0x12c] ss:$16 sps:$4 sm:$0xff]  }
  0x7a   : > { %v2283_v59 = vld [vmem:[#allocation5 + $0x120] ss:$16 sps:$4 sm:$0xff]   ;;  %v2284_v60 = vld [vmem:[#allocation5 + $0x128] ss:$16 sps:$4 sm:$0xff]   ;;  %v2285_v61 = vld [vmem:[#allocation5 + $0x104] ss:$16 sps:$4 sm:$0xff]  }
  0x7b   : > { %v2287_v62 = vld [vmem:[#allocation5 + $0x10c] ss:$16 sps:$4 sm:$0xff]   ;;  %v2289_v63 = vld [vmem:[#allocation5 + $0x100] ss:$16 sps:$4 sm:$0xff]   ;;  %v2290_v0 = vld [vmem:[#allocation5 + $0x108] ss:$16 sps:$4 sm:$0xff]  }
  0x7c   : > { %802 = vmatpush1.bf16.msra.mxu0 %v2229_v22  ;;  %915 = vmatpush1.bf16.msra.mxu1 %v2230_v23  ;;  %v2315_v1 = vld [vmem:[#allocation8 + $0x78] sm:$0xff]   ;;  %v2319_v7 = vld [vmem:[#allocation8 + $0x70] sm:$0xff]   ;;  %v2323_v12 = vld [vmem:[#allocation8 + $0x68] sm:$0xff]   ;;  %s1781_s15 = sshll.u32 %s2705_s7, 6  ;;  %s1934_s23 = sshll.u32 %s2591_s22, 10 }
  0x7d   : > { %803 = vmatprep.subr.bf16.mxu0 %v2231_v24  ;;  %916 = vmatprep.subr.bf16.mxu1 %v2233_v25  ;;  %v2291_v2 = vld [vmem:[%s2709_s8] ss:$8 sps:$4 sm:$0xff]   ;;  %v2294_v4 = vld [vmem:[%s2709_s8 + $0x14] ss:$8 sps:$4 sm:$0xff]   ;;  %v2296_v11 = vld [vmem:[%s2709_s8 + $0x10] ss:$8 sps:$4 sm:$0xff]   ;;  %s2847_s14 = scalar_lea.hbm %s2898_s5, %s1934_s23 }
  0x7e   : > { %v2317_v3 = vld [vmem:[#allocation8 + $0xf8] sm:$0xff]   ;;  %v2321_v8 = vld [vmem:[#allocation8 + $0xf0] sm:$0xff]   ;;  %v2297_v13 = vld [vmem:[%s2709_s8 + $0x24] ss:$8 sps:$4 sm:$0xff]   ;;  %s2819_s17 = scalar_lea.vmem [#allocation10], %s1781_s15  ;;  %s1651_s16 = scalar_lea.sflag [#allocation4], %s2705_s7 }
  0x7f   : > { %v2316_v5 = vld [vmem:[#allocation8 + $0x38] sm:$0xff]   ;;  %v2320_v9 = vld [vmem:[#allocation8 + $0x30] sm:$0xff]   ;;  %v2325_v14 = vld [vmem:[#allocation8 + $0xe8] sm:$0xff]   ;;  %s1664_s27 = sshll.u32 %s2819_s17, 4  ;;  %p2916_p6 = scmp.ne.s32.totalorder %s2908_s11, 0  ;;  %s2849_s27 = int_to_ptr.vmem [resolvable:$true] %s1664_s27 }
  0x80   : > { %804 = vmatpush1.bf16.msra.mxu0 %v2235_v26  ;;  %917 = vmatpush1.bf16.msra.mxu1 %v2236_v27  ;;  %v2318_v6 = vld [vmem:[#allocation8 + $0xb8] sm:$0xff]   ;;  %v2322_v10 = vld [vmem:[#allocation8 + $0xb0] sm:$0xff]   ;;  %v2324_v15 = vld [vmem:[#allocation8 + $0x28] sm:$0xff]   ;;  %s2453_s28 = scalar_lea.vmem %s2849_s27, 1024  ;;  %s2537_s22 = smov [#allocation10]  }
  0x81   : > { %805 = vmatprep.subr.bf16.mxu0 %v2237_v28  ;;  %918 = vmatprep.subr.bf16.mxu1 %v2239_v29  ;;  %v2326_v16 = vld [vmem:[#allocation8 + $0xa8] sm:$0xff]   ;;  %v2327_v17 = vld [vmem:[#allocation8 + $0x60] sm:$0xff]   ;;  %v2331_v22 = vld [vmem:[#allocation8 + $0x58] sm:$0xff]   ;;  %p2454_p4 = scmp.ne.s32.totalorder %s2849_s27, %s2453_s28  ;;  %s2457_s30 = sshll.u32 %s2537_s22, 4  ;;  %s2458_s30 = int_to_ptr.vmem [resolvable:$false] %s2457_s30 }
  0x82   : > { %v2329_v18 = vld [vmem:[#allocation8 + $0xe0] sm:$0xff]   ;;  %v2300_v23 = vld [vmem:[%s2709_s8 + $0x34] ss:$8 sps:$4 sm:$0xff]   ;;  %s2459_s9 = scalar_lea.vmem %s2458_s30, 2048  ;;  %p2460_p5 = scmp.lt.s32.totalorder %s2849_s27, %s2458_s30 }
  0x83   : > { %v2328_v19 = vld [vmem:[#allocation8 + $0x20] sm:$0xff]   ;;  %v2333_v24 = vld [vmem:[#allocation8 + $0xd8] sm:$0xff]   ;;  %v2335_v27 = vld [vmem:[#allocation8 + $0x50] sm:$0xff]   ;;  %p2455_p12 = pnand %p2454_p4, %p2916_p6  ;;  %p2461_p3 = scmp.lt.s32.totalorder %s2459_s9, %s2453_s28 }
  0x84   : > { %806 = vmatpush1.bf16.msra.mxu0 %v2241_v30  ;;  %919 = vmatpush1.bf16.msra.mxu1 %v2242_v31  ;;  %v2330_v20 = vld [vmem:[#allocation8 + $0xa0] sm:$0xff]   ;;  %v2332_v25 = vld [vmem:[#allocation8 + $0x18] sm:$0xff]   ;;  %v2337_v28 = vld [vmem:[#allocation8 + $0xd0] sm:$0xff]  }
  0x85   : > { %807 = vmatprep.subr.bf16.mxu0 %v2243_v32  ;;  %920 = vmatprep.subr.bf16.mxu1 %v2245_v33  ;;  %v2299_v21 = vld [vmem:[%s2709_s8 + $0x20] ss:$8 sps:$4 sm:$0xff]   ;;  %v2336_v29 = vld [vmem:[#allocation8 + $0x10] sm:$0xff]   ;;  %v2339_v31 = vld [vmem:[#allocation8 + $0x48] sm:$0xff]   ;;  %p2456_p0 = pneg %p2455_p12  ;;  %p2462_p7 = por %p2461_p3, %p2460_p5 }
  0x86   : > { %v2334_v26 = vld [vmem:[#allocation8 + $0x98] sm:$0xff]   ;;  %v2338_v30 = vld [vmem:[#allocation8 + $0x90] sm:$0xff]   ;;  %v2341_v32 = vld [vmem:[#allocation8 + $0xc8] sm:$0xff]  }
  0x87   : > { %v2302_v33 = vld [vmem:[%s2709_s8 + $0x30] ss:$8 sps:$4 sm:$0xff]   ;;  %p2463_p9 = pnand %p2462_p7, %p2456_p0 }
  0x88   : > { %808 = vmatpush2.bf16.msra.mxu0 %v2247_v34  ;;  %921 = vmatpush2.bf16.msra.mxu1 %v2248_v35  ;;  %v2303_v34 = vld [vmem:[%s2709_s8 + $0x44] ss:$8 sps:$4 sm:$0xff]  }
  0x89   : > { %809 = vmatprep.subr.bf16.mxu0 %v2249_v36  ;;  %922 = vmatprep.subr.bf16.mxu1 %v2251_v37  ;;  %v2340_v35 = vld [vmem:[#allocation8 + $0x8] sm:$0xff]   ;;  %v2305_v36 = vld [vmem:[%s2709_s8 + $0x40] ss:$8 sps:$4 sm:$0xff]   ;;  %v2306_v37 = vld [vmem:[%s2709_s8 + $0x54] ss:$8 sps:$4 sm:$0xff]  }
  0x8c   : > { %810 = vmatpush2.bf16.msra.mxu0 %v2253_v38  ;;  %923 = vmatpush2.bf16.msra.mxu1 %v2254_v39  ;;  %v2308_v38 = vld [vmem:[%s2709_s8 + $0x50] ss:$8 sps:$4 sm:$0xff]   ;;  %v2309_v39 = vld [vmem:[%s2709_s8 + $0x64] ss:$8 sps:$4 sm:$0xff]  }
  0x8d   : > { %811 = vmatprep.subr.bf16.mxu0 %v2255_v40  ;;  %924 = vmatprep.subr.bf16.mxu1 %v2257_v41  ;;  %v2311_v40 = vld [vmem:[%s2709_s8 + $0x60] ss:$8 sps:$4 sm:$0xff]   ;;  %v2312_v41 = vld [vmem:[%s2709_s8 + $0x74] ss:$8 sps:$4 sm:$0xff]  }
  0x90   : > { %812 = vmatpush2.bf16.msra.mxu0 %v2259_v42  ;;  %925 = vmatpush2.bf16.msra.mxu1 %v2260_v43  ;;  %v2314_v42 = vld [vmem:[%s2709_s8 + $0x70] ss:$8 sps:$4 sm:$0xff]  }
  0x91   : > { %813 = vmatprep.subr.bf16.mxu0 %v2261_v44  ;;  %926 = vmatprep.subr.bf16.mxu1 %v2263_v45  ;;  %v2342_v43 = vld [vmem:[#allocation8 + $0x88] sm:$0xff]   ;;  %v2343_v44 = vld [vmem:[#allocation8 + $0x40] sm:$0xff]  }
  0x92   : > { %v2345_v45 = vld [vmem:[#allocation8 + $0xc0] sm:$0xff]  }
  0x94   : > { %814 = vmatpush2.bf16.msra.mxu0 %v2265_v46  ;;  %927 = vmatpush2.bf16.msra.mxu1 %v2266_v47  ;;  %v2344_v46 = vld [vmem:[#allocation8] sm:$0xff]  }
  0x95   : > { %815 = vmatprep.subr.bf16.mxu0 %v2267_v49  ;;  %928 = vmatprep.subr.bf16.mxu1 %v2269_v50  ;;  %v2346_v47 = vld [vmem:[#allocation8 + $0x80] sm:$0xff]   ;;  %v372_v49 = vshrl.u32 %v371_v48, 7 }
  0x97   : > { %v377_v50 = vsub.s32 1, %v372_v49 }
  0x98   : > { %816 = vmatpush2.bf16.msra.mxu0 %v2271_v51  ;;  %929 = vmatpush2.bf16.msra.mxu1 %v2272_v52  ;;  %v385_v51 = vsub.s32 3, %v372_v49  ;;  %v373_v52 = vsub.s32 0, %v372_v49 }
  0x99   : > { %817 = vmatprep.subr.bf16.mxu0 %v2273_v53  ;;  %930 = vmatprep.subr.bf16.mxu1 %v2275_v54  ;;  %v381_v53 = vsub.s32 2, %v372_v49  ;;  %v369_v54 = vld [vmem:[#allocation7] sm:$0xf] }
  0x9c   : > { %818 = vmatpush2.bf16.msra.mxu0 %v2277_v55  ;;  %931 = vmatpush2.bf16.msra.mxu1 %v2278_v56 }
  0x9d   : > { %819 = vmatprep.subr.bf16.mxu0 %v2279_v57  ;;  %932 = vmatprep.subr.bf16.mxu1 %v2281_v58  ;;  %v2739_v57 = vrot.slane %v369_v54, %v377_v50  ;;  %v2741_v58 = vrot.slane %v369_v54, %v385_v51 }
  0xa0   : > { %820 = vmatpush2.bf16.msra.mxu0 %v2283_v59  ;;  %933 = vmatpush2.bf16.msra.mxu1 %v2284_v60  ;;  %v2743_v59 = vrot.slane %v369_v54, %v373_v52  ;;  %v2745_v60 = vrot.slane %v369_v54, %v381_v53 }
  0xa1   : > { %821 = vmatprep.subr.bf16.mxu0 %v2285_v61  ;;  %934 = vmatprep.subr.bf16.mxu1 %v2287_v62 }
  0xa4   : > { %822 = vmatpush2.bf16.msra.mxu0 %v2289_v63  ;;  %935 = vmatpush2.bf16.msra.mxu1 %v2290_v0 }
  0xa5   : > { %1982 = vmatprep.subr.bf16.mxu0 %v2315_v1  ;;  %2046 = vmatprep.subr.bf16.mxu1 %v2317_v3 }
  0xa7   : > { %824 = vmatmul.mubr.bf16.vlgmr.msra.gmra.mxu0 %v2291_v2  ;;  %937 = vmatmul.mubr.bf16.vlgmr.msra.gmra.mxu1 %v2291_v2 }
  0xa8   : > { %833 = vmatprep.mubr.bf16.mxu0 %v2294_v4  ;;  %946 = vmatprep.mubr.bf16.mxu1 %v2294_v4 }
  0xa9   : > { %1983 = vmatpush3.bf16.msra.mxu0 %v2316_v5  ;;  %2047 = vmatpush3.bf16.msra.mxu1 %v2318_v6 }
  0xaa   : > { %1984 = vmatprep.subr.bf16.mxu0 %v2319_v7  ;;  %2048 = vmatprep.subr.bf16.mxu1 %v2321_v8 }
  0xad   : > { %1985 = vmatpush3.bf16.msra.mxu0 %v2320_v9  ;;  %2049 = vmatpush3.bf16.msra.mxu1 %v2322_v10 }
  0xae   : > { %1986 = vmatprep.subr.bf16.mxu0 %v2323_v12  ;;  %2050 = vmatprep.subr.bf16.mxu1 %v2325_v14 }
  0xaf   : > { %834 = vmatmul.mubr.bf16.gmra.mxu0 %v2296_v11  ;;  %947 = vmatmul.mubr.bf16.gmra.mxu1 %v2296_v11 }
  0xb0   : > { %843 = vmatprep.mubr.bf16.mxu0 %v2297_v13  ;;  %956 = vmatprep.mubr.bf16.mxu1 %v2297_v13 }
  0xb1   : > { %1987 = vmatpush3.bf16.msra.mxu0 %v2324_v15  ;;  %2051 = vmatpush3.bf16.msra.mxu1 %v2326_v16 }
  0xb2   : > { %1988 = vmatprep.subr.bf16.mxu0 %v2327_v17  ;;  %2052 = vmatprep.subr.bf16.mxu1 %v2329_v18 }
  0xb5   : > { %1989 = vmatpush3.bf16.msra.mxu0 %v2328_v19  ;;  %2053 = vmatpush3.bf16.msra.mxu1 %v2330_v20 }
  0xb6   : > { %1990 = vmatprep.subr.bf16.mxu0 %v2331_v22  ;;  %2054 = vmatprep.subr.bf16.mxu1 %v2333_v24 }
  0xb7   : > { %844 = vmatmul.mubr.bf16.gmra.mxu0 %v2299_v21  ;;  %957 = vmatmul.mubr.bf16.gmra.mxu1 %v2299_v21 }
  0xb8   : > { %853 = vmatprep.mubr.bf16.mxu0 %v2300_v23  ;;  %966 = vmatprep.mubr.bf16.mxu1 %v2300_v23 }
  0xb9   : > { %1991 = vmatpush3.bf16.msra.mxu0 %v2332_v25  ;;  %2055 = vmatpush3.bf16.msra.mxu1 %v2334_v26 }
  0xba   : > { %1992 = vmatprep.subr.bf16.mxu0 %v2335_v27  ;;  %2056 = vmatprep.subr.bf16.mxu1 %v2337_v28 }
  0xbd   : > { %1993 = vmatpush3.bf16.msra.mxu0 %v2336_v29  ;;  %2057 = vmatpush3.bf16.msra.mxu1 %v2338_v30 }
  0xbe   : > { %1994 = vmatprep.subr.bf16.mxu0 %v2339_v31  ;;  %2058 = vmatprep.subr.bf16.mxu1 %v2341_v32 }
  0xbf   : > { %854 = vmatmul.mubr.bf16.gmra.mxu0 %v2302_v33  ;;  %967 = vmatmul.mubr.bf16.gmra.mxu1 %v2302_v33 }
  0xc0   : > { %863 = vmatprep.mubr.bf16.mxu0 %v2303_v34  ;;  %976 = vmatprep.mubr.bf16.mxu1 %v2303_v34 }
  0xc1   : > { %1995 = vmatpush3.bf16.msra.mxu0 %v2340_v35  ;;  %2059 = vmatpush3.bf16.msra.mxu1 %v2342_v43 }
  0xc2   : > { %1996 = vmatprep.subr.bf16.mxu0 %v2343_v44  ;;  %2060 = vmatprep.subr.bf16.mxu1 %v2345_v45 }
  0xc5   : > { %1997 = vmatpush3.bf16.msra.mxu0 %v2344_v46  ;;  %2061 = vmatpush3.bf16.msra.mxu1 %v2346_v47 }
  0xc7   : > { %864 = vmatmul.mubr.bf16.gmra.mxu0 %v2305_v36  ;;  %977 = vmatmul.mubr.bf16.gmra.mxu1 %v2305_v36 }
  0xc8   : > { %873 = vmatprep.mubr.bf16.mxu0 %v2306_v37  ;;  %986 = vmatprep.mubr.bf16.mxu1 %v2306_v37 }
  0xcf   : > { %874 = vmatmul.mubr.bf16.gmra.mxu0 %v2308_v38  ;;  %987 = vmatmul.mubr.bf16.gmra.mxu1 %v2308_v38 }
  0xd0   : > { %883 = vmatprep.mubr.bf16.mxu0 %v2309_v39  ;;  %996 = vmatprep.mubr.bf16.mxu1 %v2309_v39 }
  0xd7   : > { %884 = vmatmul.mubr.bf16.gmra.mxu0 %v2311_v40  ;;  %997 = vmatmul.mubr.bf16.gmra.mxu1 %v2311_v40 }
  0xd8   : > { %893 = vmatprep.mubr.bf16.mxu0 %v2312_v41  ;;  %1006 = vmatprep.mubr.bf16.mxu1 %v2312_v41 }
  0xdf   : > { %894 = vmatmul.mubr.bf16.gmra.mxu0 %v2314_v42  ;;  %1007 = vmatmul.mubr.bf16.gmra.mxu1 %v2314_v42 }
 0x167   : > { %v825_v55 = vpop.f32.mrf.mxu0  ;;  %v938_v56 = vpop.f32.mrf.mxu1 }
 0x168   : > { %v826_v5 = vadd.f32 %v825_v55, %v2743_v59  ;;  %v939_v6 = vadd.f32 %v938_v56, %v2745_v60 }
 0x169   : > { %v827_v61 = vpop.f32.mrf.mxu0  ;;  %v940_v62 = vpop.f32.mrf.mxu1 }
 0x16a   : > { %v828_v1 = vadd.f32 %v827_v61, %v2739_v57  ;;  %v941_v2 = vadd.f32 %v940_v62, %v2741_v58  ;;  %v1017_v19 = vmax.f32 %v826_v5, 0.0  ;;  %v1019_v20 = vmax.f32 %v939_v6, 0.0 }
 0x16b   : > { %v829_v63 = vpop.f32.mrf.mxu0  ;;  %v942_v0 = vpop.f32.mrf.mxu1 }
 0x16c   : > { %v830_v3 = vadd.f32 %v829_v63, %v2743_v59  ;;  %v943_v4 = vadd.f32 %v942_v0, %v2745_v60  ;;  %v1018_v15 = vmax.f32 %v828_v1, 0.0  ;;  %v1020_v16 = vmax.f32 %v941_v2, 0.0 }
 0x16d   : > { %v831_v7 = vpop.f32.mrf.mxu0  ;;  %v944_v8 = vpop.f32.mrf.mxu1 }
 0x16e   : > { %v832_v9 = vadd.f32 %v831_v7, %v2739_v57  ;;  %v945_v10 = vadd.f32 %v944_v8, %v2741_v58  ;;  %v1021_v11 = vmax.f32 %v830_v3, 0.0  ;;  %v1023_v12 = vmax.f32 %v943_v4, 0.0 }
 0x16f   : > { %v835_v13 = vpop.f32.mrf.mxu0  ;;  %v948_v14 = vpop.f32.mrf.mxu1 }
 0x170   : > { %v1022_v17 = vmax.f32 %v832_v9, 0.0  ;;  %v1024_v18 = vmax.f32 %v945_v10, 0.0  ;;  %v1081_v25 = vpack.c.bf16 %v1021_v11, %v1017_v19  ;;  %v1083_v26 = vpack.c.bf16 %v1023_v12, %v1019_v20 }
 0x171   : > { %v837_v21 = vpop.f32.mrf.mxu0  ;;  %v950_v22 = vpop.f32.mrf.mxu1  ;;  %v836_v33 = vadd.f32 %v835_v13, %v2743_v59  ;;  %v949_v34 = vadd.f32 %v948_v14, %v2745_v60 }
 0x172   : > { %v1082_v23 = vpack.c.bf16 %v1022_v17, %v1018_v15  ;;  %v1084_v24 = vpack.c.bf16 %v1024_v18, %v1020_v16  ;;  %v838_v27 = vadd.f32 %v837_v21, %v2739_v57  ;;  %v951_v30 = vadd.f32 %v950_v22, %v2741_v58 }
 0x173   : > { %v839_v28 = vpop.f32.mrf.mxu0  ;;  %v952_v29 = vpop.f32.mrf.mxu1  ;;  %v1025_v47 = vmax.f32 %v836_v33, 0.0  ;;  %v1027_v48 = vmax.f32 %v949_v34, 0.0 }
 0x174   : > { %v840_v31 = vadd.f32 %v839_v28, %v2743_v59  ;;  %v953_v32 = vadd.f32 %v952_v29, %v2745_v60  ;;  %1408 = vmatprep.mubr.bf16.mxu0 %v1082_v23  ;;  %1505 = vmatprep.mubr.bf16.mxu1 %v1084_v24  ;;  %v1026_v43 = vmax.f32 %v838_v27, 0.0  ;;  %v1028_v44 = vmax.f32 %v951_v30, 0.0 }
 0x175   : > { %v841_v35 = vpop.f32.mrf.mxu0  ;;  %v954_v36 = vpop.f32.mrf.mxu1  ;;  %1409 = vmatmul.mubr.bf16.vlgmr.msra.gmra.mxu0 %v1081_v25  ;;  %1506 = vmatmul.mubr.bf16.vlgmr.msra.gmra.mxu1 %v1083_v26 }
 0x176   : > { %v842_v37 = vadd.f32 %v841_v35, %v2739_v57  ;;  %v955_v38 = vadd.f32 %v954_v36, %v2741_v58  ;;  %v1029_v39 = vmax.f32 %v840_v31, 0.0  ;;  %v1031_v40 = vmax.f32 %v953_v32, 0.0 }
 0x177   : > { %v845_v41 = vpop.f32.mrf.mxu0  ;;  %v958_v42 = vpop.f32.mrf.mxu1 }
 0x178   : > { %v1030_v45 = vmax.f32 %v842_v37, 0.0  ;;  %v1032_v46 = vmax.f32 %v955_v38, 0.0  ;;  %v1085_v53 = vpack.c.bf16 %v1029_v39, %v1025_v47  ;;  %v1087_v54 = vpack.c.bf16 %v1031_v40, %v1027_v48 }
 0x179   : > { %v847_v49 = vpop.f32.mrf.mxu0  ;;  %v960_v50 = vpop.f32.mrf.mxu1  ;;  %v846_v1 = vadd.f32 %v845_v41, %v2743_v59  ;;  %v959_v2 = vadd.f32 %v958_v42, %v2745_v60 }
 0x17a   : > { %v1086_v51 = vpack.c.bf16 %v1030_v45, %v1026_v43  ;;  %v1088_v52 = vpack.c.bf16 %v1032_v46, %v1028_v44  ;;  %v848_v55 = vadd.f32 %v847_v49, %v2739_v57  ;;  %v961_v62 = vadd.f32 %v960_v50, %v2741_v58 }
 0x17b   : > { %v849_v56 = vpop.f32.mrf.mxu0  ;;  %v962_v61 = vpop.f32.mrf.mxu1  ;;  %v1033_v15 = vmax.f32 %v846_v1, 0.0  ;;  %v1035_v16 = vmax.f32 %v959_v2, 0.0 }
 0x17c   : > { %v850_v63 = vadd.f32 %v849_v56, %v2743_v59  ;;  %v963_v0 = vadd.f32 %v962_v61, %v2745_v60  ;;  %1416 = vmatprep.mubr.bf16.mxu0 %v1086_v51  ;;  %1513 = vmatprep.mubr.bf16.mxu1 %v1088_v52  ;;  %v1034_v11 = vmax.f32 %v848_v55, 0.0  ;;  %v1036_v12 = vmax.f32 %v961_v62, 0.0 }
 0x17d   : > { %v851_v3 = vpop.f32.mrf.mxu0  ;;  %v964_v4 = vpop.f32.mrf.mxu1  ;;  %1417 = vmatmul.mubr.bf16.gmra.mxu0 %v1085_v53  ;;  %1514 = vmatmul.mubr.bf16.gmra.mxu1 %v1087_v54 }
 0x17e   : > { %v852_v5 = vadd.f32 %v851_v3, %v2739_v57  ;;  %v965_v6 = vadd.f32 %v964_v4, %v2741_v58  ;;  %v1037_v7 = vmax.f32 %v850_v63, 0.0  ;;  %v1039_v8 = vmax.f32 %v963_v0, 0.0 }
 0x17f   : > { %v855_v9 = vpop.f32.mrf.mxu0  ;;  %v968_v10 = vpop.f32.mrf.mxu1 }
 0x180   : > { %v1038_v13 = vmax.f32 %v852_v5, 0.0  ;;  %v1040_v14 = vmax.f32 %v965_v6, 0.0  ;;  %v1089_v21 = vpack.c.bf16 %v1037_v7, %v1033_v15  ;;  %v1091_v22 = vpack.c.bf16 %v1039_v8, %v1035_v16 }
 0x181   : > { %v857_v17 = vpop.f32.mrf.mxu0  ;;  %v970_v18 = vpop.f32.mrf.mxu1  ;;  %v856_v29 = vadd.f32 %v855_v9, %v2743_v59  ;;  %v969_v30 = vadd.f32 %v968_v10, %v2745_v60 }
 0x182   : > { %v1090_v19 = vpack.c.bf16 %v1038_v13, %v1034_v11  ;;  %v1092_v20 = vpack.c.bf16 %v1040_v14, %v1036_v12  ;;  %v858_v23 = vadd.f32 %v857_v17, %v2739_v57  ;;  %v971_v26 = vadd.f32 %v970_v18, %v2741_v58 }
 0x183   : > { %v859_v24 = vpop.f32.mrf.mxu0  ;;  %v972_v25 = vpop.f32.mrf.mxu1  ;;  %v1041_v43 = vmax.f32 %v856_v29, 0.0  ;;  %v1043_v44 = vmax.f32 %v969_v30, 0.0 }
 0x184   : > { %v860_v27 = vadd.f32 %v859_v24, %v2743_v59  ;;  %v973_v28 = vadd.f32 %v972_v25, %v2745_v60  ;;  %1424 = vmatprep.mubr.bf16.mxu0 %v1090_v19  ;;  %1521 = vmatprep.mubr.bf16.mxu1 %v1092_v20  ;;  %v1042_v39 = vmax.f32 %v858_v23, 0.0  ;;  %v1044_v40 = vmax.f32 %v971_v26, 0.0 }
 0x185   : > { %v861_v31 = vpop.f32.mrf.mxu0  ;;  %v974_v32 = vpop.f32.mrf.mxu1  ;;  %1425 = vmatmul.mubr.bf16.gmra.mxu0 %v1089_v21  ;;  %1522 = vmatmul.mubr.bf16.gmra.mxu1 %v1091_v22 }
 0x186   : > { %v862_v33 = vadd.f32 %v861_v31, %v2739_v57  ;;  %v975_v34 = vadd.f32 %v974_v32, %v2741_v58  ;;  %v1045_v35 = vmax.f32 %v860_v27, 0.0  ;;  %v1047_v36 = vmax.f32 %v973_v28, 0.0 }
 0x187   : > { %v865_v37 = vpop.f32.mrf.mxu0  ;;  %v978_v38 = vpop.f32.mrf.mxu1 }
 0x188   : > { %v1046_v41 = vmax.f32 %v862_v33, 0.0  ;;  %v1048_v42 = vmax.f32 %v975_v34, 0.0  ;;  %v1093_v49 = vpack.c.bf16 %v1045_v35, %v1041_v43  ;;  %v1095_v50 = vpack.c.bf16 %v1047_v36, %v1043_v44 }
 0x189   : > { %v867_v45 = vpop.f32.mrf.mxu0  ;;  %v980_v46 = vpop.f32.mrf.mxu1  ;;  %v866_v61 = vadd.f32 %v865_v37, %v2743_v59  ;;  %v979_v62 = vadd.f32 %v978_v38, %v2745_v60 }
 0x18a   : > { %v1094_v47 = vpack.c.bf16 %v1046_v41, %v1042_v39  ;;  %v1096_v48 = vpack.c.bf16 %v1048_v42, %v1044_v40  ;;  %v868_v51 = vadd.f32 %v867_v45, %v2739_v57  ;;  %v981_v54 = vadd.f32 %v980_v46, %v2741_v58 }
 0x18b   : > { %v869_v52 = vpop.f32.mrf.mxu0  ;;  %v982_v53 = vpop.f32.mrf.mxu1  ;;  %v1049_v11 = vmax.f32 %v866_v61, 0.0  ;;  %v1051_v12 = vmax.f32 %v979_v62, 0.0 }
 0x18c   : > { %v870_v55 = vadd.f32 %v869_v52, %v2743_v59  ;;  %v983_v56 = vadd.f32 %v982_v53, %v2745_v60  ;;  %1432 = vmatprep.mubr.bf16.mxu0 %v1094_v47  ;;  %1529 = vmatprep.mubr.bf16.mxu1 %v1096_v48  ;;  %v1050_v7 = vmax.f32 %v868_v51, 0.0  ;;  %v1052_v8 = vmax.f32 %v981_v54, 0.0 }
 0x18d   : > { %v871_v63 = vpop.f32.mrf.mxu0  ;;  %v984_v0 = vpop.f32.mrf.mxu1  ;;  %1433 = vmatmul.mubr.bf16.gmra.mxu0 %v1093_v49  ;;  %1530 = vmatmul.mubr.bf16.gmra.mxu1 %v1095_v50 }
 0x18e   : > { %v872_v1 = vadd.f32 %v871_v63, %v2739_v57  ;;  %v985_v2 = vadd.f32 %v984_v0, %v2741_v58  ;;  %v1053_v3 = vmax.f32 %v870_v55, 0.0  ;;  %v1055_v4 = vmax.f32 %v983_v56, 0.0 }
 0x18f   : > { %v875_v5 = vpop.f32.mrf.mxu0  ;;  %v988_v6 = vpop.f32.mrf.mxu1 }
 0x190   : > { %v1054_v9 = vmax.f32 %v872_v1, 0.0  ;;  %v1056_v10 = vmax.f32 %v985_v2, 0.0  ;;  %v1097_v17 = vpack.c.bf16 %v1053_v3, %v1049_v11  ;;  %v1099_v18 = vpack.c.bf16 %v1055_v4, %v1051_v12 }
 0x191   : > { %v877_v13 = vpop.f32.mrf.mxu0  ;;  %v990_v14 = vpop.f32.mrf.mxu1  ;;  %v876_v25 = vadd.f32 %v875_v5, %v2743_v59  ;;  %v989_v26 = vadd.f32 %v988_v6, %v2745_v60 }
 0x192   : > { %v1098_v15 = vpack.c.bf16 %v1054_v9, %v1050_v7  ;;  %v1100_v16 = vpack.c.bf16 %v1056_v10, %v1052_v8  ;;  %v878_v19 = vadd.f32 %v877_v13, %v2739_v57  ;;  %v991_v22 = vadd.f32 %v990_v14, %v2741_v58 }
 0x193   : > { %v879_v20 = vpop.f32.mrf.mxu0  ;;  %v992_v21 = vpop.f32.mrf.mxu1  ;;  %v1057_v39 = vmax.f32 %v876_v25, 0.0  ;;  %v1059_v40 = vmax.f32 %v989_v26, 0.0 }
 0x194   : > { %v880_v23 = vadd.f32 %v879_v20, %v2743_v59  ;;  %v993_v24 = vadd.f32 %v992_v21, %v2745_v60  ;;  %1440 = vmatprep.mubr.bf16.mxu0 %v1098_v15  ;;  %1537 = vmatprep.mubr.bf16.mxu1 %v1100_v16  ;;  %v1058_v35 = vmax.f32 %v878_v19, 0.0  ;;  %v1060_v36 = vmax.f32 %v991_v22, 0.0 }
 0x195   : > { %v881_v27 = vpop.f32.mrf.mxu0  ;;  %v994_v28 = vpop.f32.mrf.mxu1  ;;  %1441 = vmatmul.mubr.bf16.gmra.mxu0 %v1097_v17  ;;  %1538 = vmatmul.mubr.bf16.gmra.mxu1 %v1099_v18 }
 0x196   : > { %v882_v29 = vadd.f32 %v881_v27, %v2739_v57  ;;  %v995_v30 = vadd.f32 %v994_v28, %v2741_v58  ;;  %v1061_v31 = vmax.f32 %v880_v23, 0.0  ;;  %v1063_v32 = vmax.f32 %v993_v24, 0.0 }
 0x197   : > { %v885_v33 = vpop.f32.mrf.mxu0  ;;  %v998_v34 = vpop.f32.mrf.mxu1 }
 0x198   : > { %v1062_v37 = vmax.f32 %v882_v29, 0.0  ;;  %v1064_v38 = vmax.f32 %v995_v30, 0.0  ;;  %v1101_v45 = vpack.c.bf16 %v1061_v31, %v1057_v39  ;;  %v1103_v46 = vpack.c.bf16 %v1063_v32, %v1059_v40  ;;  %v2814_v40 = vld [vmem:[%s2897_s4] ss:$0 sm:$0xff] }
 0x199   : > { %v887_v41 = vpop.f32.mrf.mxu0  ;;  %v1000_v42 = vpop.f32.mrf.mxu1  ;;  %v886_v53 = vadd.f32 %v885_v33, %v2743_v59  ;;  %v999_v54 = vadd.f32 %v998_v34, %v2745_v60 }
 0x19a   : > { %v1102_v43 = vpack.c.bf16 %v1062_v37, %v1058_v35  ;;  %v1104_v44 = vpack.c.bf16 %v1064_v38, %v1060_v36  ;;  %v888_v47 = vadd.f32 %v887_v41, %v2739_v57  ;;  %v1001_v50 = vadd.f32 %v1000_v42, %v2741_v58 }
 0x19b   : > { %v889_v48 = vpop.f32.mrf.mxu0  ;;  %v1002_v49 = vpop.f32.mrf.mxu1  ;;  %v1065_v7 = vmax.f32 %v886_v53, 0.0  ;;  %v1067_v8 = vmax.f32 %v999_v54, 0.0 }
 0x19c   : > { %v890_v51 = vadd.f32 %v889_v48, %v2743_v59  ;;  %v1003_v52 = vadd.f32 %v1002_v49, %v2745_v60  ;;  %1448 = vmatprep.mubr.bf16.mxu0 %v1102_v43  ;;  %1545 = vmatprep.mubr.bf16.mxu1 %v1104_v44  ;;  %v1066_v3 = vmax.f32 %v888_v47, 0.0  ;;  %v1068_v4 = vmax.f32 %v1001_v50, 0.0 }
 0x19d   : > { %v891_v55 = vpop.f32.mrf.mxu0  ;;  %v1004_v56 = vpop.f32.mrf.mxu1  ;;  %1449 = vmatmul.mubr.bf16.gmra.mxu0 %v1101_v45  ;;  %1546 = vmatmul.mubr.bf16.gmra.mxu1 %v1103_v46 }
 0x19e   : > { %v892_v61 = vadd.f32 %v891_v55, %v2739_v57  ;;  %v1005_v62 = vadd.f32 %v1004_v56, %v2741_v58  ;;  %v1069_v63 = vmax.f32 %v890_v51, 0.0  ;;  %v1071_v0 = vmax.f32 %v1003_v52, 0.0 }
 0x19f   : > { %v895_v1 = vpop.f32.mrf.mxu0  ;;  %v1008_v2 = vpop.f32.mrf.mxu1 }
 0x1a0   : > { %v1070_v5 = vmax.f32 %v892_v61, 0.0  ;;  %v1072_v6 = vmax.f32 %v1005_v62, 0.0  ;;  %v1105_v13 = vpack.c.bf16 %v1069_v63, %v1065_v7  ;;  %v1107_v14 = vpack.c.bf16 %v1071_v0, %v1067_v8 }
 0x1a1   : > { %v897_v9 = vpop.f32.mrf.mxu0  ;;  %v1010_v10 = vpop.f32.mrf.mxu1  ;;  %v896_v21 = vadd.f32 %v895_v1, %v2743_v59  ;;  %v1009_v22 = vadd.f32 %v1008_v2, %v2745_v60 }
 0x1a2   : > { %v1106_v11 = vpack.c.bf16 %v1070_v5, %v1066_v3  ;;  %v1108_v12 = vpack.c.bf16 %v1072_v6, %v1068_v4  ;;  %v898_v15 = vadd.f32 %v897_v9, %v2739_v57  ;;  %v1011_v18 = vadd.f32 %v1010_v10, %v2741_v58 }
 0x1a3   : > { %v899_v16 = vpop.f32.mrf.mxu0  ;;  %v1012_v17 = vpop.f32.mrf.mxu1  ;;  %v1073_v33 = vmax.f32 %v896_v21, 0.0  ;;  %v1075_v34 = vmax.f32 %v1009_v22, 0.0 }
 0x1a4   : > { %v900_v19 = vadd.f32 %v899_v16, %v2743_v59  ;;  %v1013_v20 = vadd.f32 %v1012_v17, %v2745_v60  ;;  %1456 = vmatprep.mubr.bf16.mxu0 %v1106_v11  ;;  %1553 = vmatprep.mubr.bf16.mxu1 %v1108_v12  ;;  %v1074_v29 = vmax.f32 %v898_v15, 0.0  ;;  %v1076_v30 = vmax.f32 %v1011_v18, 0.0 }
 0x1a5   : > { %v901_v23 = vpop.f32.mrf.mxu0  ;;  %v1014_v24 = vpop.f32.mrf.mxu1  ;;  %1457 = vmatmul.mubr.bf16.gmra.mxu0 %v1105_v13  ;;  %1554 = vmatmul.mubr.bf16.gmra.mxu1 %v1107_v14 }
 0x1a6   : > { %v902_v25 = vadd.f32 %v901_v23, %v2739_v57  ;;  %v1015_v26 = vadd.f32 %v1014_v24, %v2741_v58  ;;  %v1077_v27 = vmax.f32 %v900_v19, 0.0  ;;  %v1079_v28 = vmax.f32 %v1013_v20, 0.0 }
 0x1a8   : > { %v1078_v31 = vmax.f32 %v902_v25, 0.0  ;;  %v1080_v32 = vmax.f32 %v1015_v26, 0.0  ;;  %v1109_v36 = vpack.c.bf16 %v1077_v27, %v1073_v33  ;;  %v1111_v60 = vpack.c.bf16 %v1079_v28, %v1075_v34 }
 0x1aa   : > { %v1110_v35 = vpack.c.bf16 %v1078_v31, %v1074_v29  ;;  %v1112_v59 = vpack.c.bf16 %v1080_v32, %v1076_v30 }
 0x1ac   : > { %1464 = vmatprep.mubr.bf16.mxu0 %v1110_v35  ;;  %1561 = vmatprep.mubr.bf16.mxu1 %v1112_v59 }
 0x1ad   : > { %1465 = vmatmul.mubr.bf16.gmra.mxu0 %v1109_v36  ;;  %1562 = vmatmul.mubr.bf16.gmra.mxu1 %v1111_v60 }
 0x235   : > { %v1998_v37 = vpop.f32.mrf.mxu0  ;;  %v2062_v57 = vpop.f32.mrf.mxu1 }
 0x237   : > { %v1999_v58 = vpop.f32.mrf.mxu0  ;;  %v2063_v38 = vpop.f32.mrf.mxu1 }
 0x238   : > { %v2000_v39 = vadd.f32 %v1999_v58, %v1998_v37  ;;  %v2064_v49 = vadd.f32 %v2063_v38, %v2062_v57 }
 0x239   : > { %v2001_v41 = vpop.f32.mrf.mxu0  ;;  %v2065_v42 = vpop.f32.mrf.mxu1 }
 0x23a   : > { %v1411_v45 = vadd.f32 %v2000_v39, %v2814_v40 }
 0x23b   : > { %v2002_v43 = vpop.f32.mrf.mxu0  ;;  %v2066_v44 = vpop.f32.mrf.mxu1 }
 0x23c   : > { %v2003_v46 = vadd.f32 %v2002_v43, %v2001_v41  ;;  %v2067_v51 = vadd.f32 %v2066_v44, %v2065_v42  ;;  %v1508_v54 = vadd.f32 %v2064_v49, %v1411_v45 }
 0x23d   : > { %v2004_v47 = vpop.f32.mrf.mxu0  ;;  %v2068_v48 = vpop.f32.mrf.mxu1 }
 0x23e   : > { %v1414_v50 = vadd.f32 %v2003_v46, %v2814_v40 }
 0x23f   : > { %v2005_v52 = vpop.f32.mrf.mxu0  ;;  %v2069_v53 = vpop.f32.mrf.mxu1 }
 0x240   : > { %v1511_v55 = vadd.f32 %v2067_v51, %v1414_v50  ;;  %v2006_v56 = vadd.f32 %v2005_v52, %v2004_v47  ;;  %v2070_v6 = vadd.f32 %v2069_v53, %v2068_v48 }
 0x241   : > { %v2007_v61 = vpop.f32.mrf.mxu0  ;;  %v2071_v62 = vpop.f32.mrf.mxu1 }
 0x242   : > { %v1938_v63 = vpack.c.bf16 %v1511_v55, %v1508_v54  ;;  %v1419_v2 = vadd.f32 %v2006_v56, %v2814_v40 }
 0x243   : > { %v2008_v0 = vpop.f32.mrf.mxu0  ;;  %v2072_v1 = vpop.f32.mrf.mxu1 }
 0x244   : > { %1939 = vst [vmem:[%s2819_s17] sm:$0xff] %v1938_v63   ;;  %v2009_v3 = vadd.f32 %v2008_v0, %v2007_v61  ;;  %v2073_v8 = vadd.f32 %v2072_v1, %v2071_v62  ;;  %v1516_v11 = vadd.f32 %v2070_v6, %v1419_v2 }
 0x245   : > { %v2010_v4 = vpop.f32.mrf.mxu0  ;;  %v2074_v5 = vpop.f32.mrf.mxu1 }
 0x246   : > { %v1422_v7 = vadd.f32 %v2009_v3, %v2814_v40 }
 0x247   : > { %v2011_v9 = vpop.f32.mrf.mxu0  ;;  %v2075_v10 = vpop.f32.mrf.mxu1 }
 0x248   : > { %v1519_v12 = vadd.f32 %v2073_v8, %v1422_v7  ;;  %v2012_v13 = vadd.f32 %v2011_v9, %v2010_v4  ;;  %v2076_v23 = vadd.f32 %v2075_v10, %v2074_v5 }
 0x249   : > { %v2013_v14 = vpop.f32.mrf.mxu0  ;;  %v2077_v15 = vpop.f32.mrf.mxu1 }
 0x24a   : > { %v1943_v16 = vpack.c.bf16 %v1519_v12, %v1516_v11  ;;  %v1427_v19 = vadd.f32 %v2012_v13, %v2814_v40 }
 0x24b   : > { %v2014_v17 = vpop.f32.mrf.mxu0  ;;  %v2078_v18 = vpop.f32.mrf.mxu1 }
 0x24c   : > { %1975 = vst [vmem:[%s2819_s17 + $0x8] sm:$0xff] %v1943_v16   ;;  %v2015_v20 = vadd.f32 %v2014_v17, %v2013_v14  ;;  %v2079_v25 = vadd.f32 %v2078_v18, %v2077_v15  ;;  %v1524_v28 = vadd.f32 %v2076_v23, %v1427_v19 }
 0x24d   : > { %v2016_v21 = vpop.f32.mrf.mxu0  ;;  %v2080_v22 = vpop.f32.mrf.mxu1 }
 0x24e   : > { %v1430_v24 = vadd.f32 %v2015_v20, %v2814_v40 }
 0x24f   : > { %v2017_v26 = vpop.f32.mrf.mxu0  ;;  %v2081_v27 = vpop.f32.mrf.mxu1 }
 0x250   : > { %v1527_v29 = vadd.f32 %v2079_v25, %v1430_v24  ;;  %v2018_v30 = vadd.f32 %v2017_v26, %v2016_v21  ;;  %v2082_v57 = vadd.f32 %v2081_v27, %v2080_v22 }
 0x251   : > { %v2019_v31 = vpop.f32.mrf.mxu0  ;;  %v2083_v32 = vpop.f32.mrf.mxu1 }
 0x252   : > { %v1948_v33 = vpack.c.bf16 %v1527_v29, %v1524_v28  ;;  %v1435_v59 = vadd.f32 %v2018_v30, %v2814_v40 }
 0x253   : > { %v2020_v34 = vpop.f32.mrf.mxu0  ;;  %v2084_v35 = vpop.f32.mrf.mxu1 }
 0x254   : > { %1976 = vst [vmem:[%s2819_s17 + $0x10] sm:$0xff] %v1948_v33   ;;  %v2021_v36 = vadd.f32 %v2020_v34, %v2019_v31  ;;  %v2085_v38 = vadd.f32 %v2084_v35, %v2083_v32  ;;  %v1532_v42 = vadd.f32 %v2082_v57, %v1435_v59 }
 0x255   : > { %v2022_v60 = vpop.f32.mrf.mxu0  ;;  %v2086_v37 = vpop.f32.mrf.mxu1 }
 0x256   : > { %v1438_v58 = vadd.f32 %v2021_v36, %v2814_v40 }
 0x257   : > { %v2023_v39 = vpop.f32.mrf.mxu0  ;;  %v2087_v41 = vpop.f32.mrf.mxu1 }
 0x258   : > { %v1535_v43 = vadd.f32 %v2085_v38, %v1438_v58  ;;  %v2024_v44 = vadd.f32 %v2023_v39, %v2022_v60  ;;  %v2088_v54 = vadd.f32 %v2087_v41, %v2086_v37 }
 0x259   : > { %v2025_v45 = vpop.f32.mrf.mxu0  ;;  %v2089_v46 = vpop.f32.mrf.mxu1 }
 0x25a   : > { %v1953_v47 = vpack.c.bf16 %v1535_v43, %v1532_v42  ;;  %v1443_v50 = vadd.f32 %v2024_v44, %v2814_v40 }
 0x25b   : > { %v2026_v48 = vpop.f32.mrf.mxu0  ;;  %v2090_v49 = vpop.f32.mrf.mxu1 }
 0x25c   : > { %1977 = vst [vmem:[%s2819_s17 + $0x18] sm:$0xff] %v1953_v47   ;;  %v2027_v51 = vadd.f32 %v2026_v48, %v2025_v45  ;;  %v2091_v56 = vadd.f32 %v2090_v49, %v2089_v46  ;;  %v1540_v63 = vadd.f32 %v2088_v54, %v1443_v50 }
 0x25d   : > { %v2028_v52 = vpop.f32.mrf.mxu0  ;;  %v2092_v53 = vpop.f32.mrf.mxu1 }
 0x25e   : > { %v1446_v55 = vadd.f32 %v2027_v51, %v2814_v40 }
 0x25f   : > { %v2029_v61 = vpop.f32.mrf.mxu0  ;;  %v2093_v62 = vpop.f32.mrf.mxu1 }
 0x260   : > { %v1543_v0 = vadd.f32 %v2091_v56, %v1446_v55  ;;  %v2030_v1 = vadd.f32 %v2029_v61, %v2028_v52  ;;  %v2094_v11 = vadd.f32 %v2093_v62, %v2092_v53 }
 0x261   : > { %v2031_v2 = vpop.f32.mrf.mxu0  ;;  %v2095_v3 = vpop.f32.mrf.mxu1 }
 0x262   : > { %v1958_v4 = vpack.c.bf16 %v1543_v0, %v1540_v63  ;;  %v1451_v7 = vadd.f32 %v2030_v1, %v2814_v40 }
 0x263   : > { %v2032_v5 = vpop.f32.mrf.mxu0  ;;  %v2096_v6 = vpop.f32.mrf.mxu1 }
 0x264   : > { %1978 = vst [vmem:[%s2819_s17 + $0x20] sm:$0xff] %v1958_v4   ;;  %v2033_v8 = vadd.f32 %v2032_v5, %v2031_v2  ;;  %v2097_v13 = vadd.f32 %v2096_v6, %v2095_v3  ;;  %v1548_v16 = vadd.f32 %v2094_v11, %v1451_v7 }
 0x265   : > { %v2034_v9 = vpop.f32.mrf.mxu0  ;;  %v2098_v10 = vpop.f32.mrf.mxu1 }
 0x266   : > { %v1454_v12 = vadd.f32 %v2033_v8, %v2814_v40 }
 0x267   : > { %v2035_v14 = vpop.f32.mrf.mxu0  ;;  %v2099_v15 = vpop.f32.mrf.mxu1 }
 0x268   : > { %v1551_v17 = vadd.f32 %v2097_v13, %v1454_v12  ;;  %v2036_v18 = vadd.f32 %v2035_v14, %v2034_v9  ;;  %v2100_v28 = vadd.f32 %v2099_v15, %v2098_v10 }
 0x269   : > { %v2037_v19 = vpop.f32.mrf.mxu0  ;;  %v2101_v20 = vpop.f32.mrf.mxu1 }
 0x26a   : > { %v1963_v21 = vpack.c.bf16 %v1551_v17, %v1548_v16  ;;  %v1459_v24 = vadd.f32 %v2036_v18, %v2814_v40 }
 0x26b   : > { %v2038_v22 = vpop.f32.mrf.mxu0  ;;  %v2102_v23 = vpop.f32.mrf.mxu1 }
 0x26c   : > { %1979 = vst [vmem:[%s2819_s17 + $0x28] sm:$0xff] %v1963_v21   ;;  %v2039_v25 = vadd.f32 %v2038_v22, %v2037_v19  ;;  %v2103_v30 = vadd.f32 %v2102_v23, %v2101_v20  ;;  %v1556_v33 = vadd.f32 %v2100_v28, %v1459_v24 }
 0x26d   : > { %v2040_v26 = vpop.f32.mrf.mxu0  ;;  %v2104_v27 = vpop.f32.mrf.mxu1 }
 0x26e   : > { %v1462_v29 = vadd.f32 %v2039_v25, %v2814_v40 }
 0x26f   : > { %v2041_v31 = vpop.f32.mrf.mxu0  ;;  %v2105_v32 = vpop.f32.mrf.mxu1 }
 0x270   : > { %v1559_v34 = vadd.f32 %v2103_v30, %v1462_v29  ;;  %v2042_v35 = vadd.f32 %v2041_v31, %v2040_v26  ;;  %v2106_v39 = vadd.f32 %v2105_v32, %v2104_v27 }
 0x271   : > { %v2043_v59 = vpop.f32.mrf.mxu0  ;;  %v2107_v36 = vpop.f32.mrf.mxu1 }
 0x272   : > { %v1968_v60 = vpack.c.bf16 %v1559_v34, %v1556_v33  ;;  %v1467_v58 = vadd.f32 %v2042_v35, %v2814_v40 }
 0x273   : > { %v2044_v37 = vpop.f32.mrf.mxu0  ;;  %v2108_v57 = vpop.f32.mrf.mxu1 }
 0x274   : > { %1980 = vst [vmem:[%s2819_s17 + $0x30] sm:$0xff] %v1968_v60   ;;  %v2045_v38 = vadd.f32 %v2044_v37, %v2043_v59  ;;  %v2109_v42 = vadd.f32 %v2108_v57, %v2107_v36  ;;  %v1564_v43 = vadd.f32 %v2106_v39, %v1467_v58 }
 0x276   : > { %v1470_v41 = vadd.f32 %v2045_v38, %v2814_v40 }
 0x278   : > { %v1567_v44 = vadd.f32 %v2109_v42, %v1470_v41 }
 0x27a   : > { %v1973_v45 = vpack.c.bf16 %v1567_v44, %v1564_v43 }
 0x27c   : > { %1981 = vst [vmem:[%s2819_s17 + $0x38] sm:$0xff] %v1973_v45  }
 0x27d   : > { %2466 = shalt.err (!%p2463_p9)
}
 0x27e   : > { %s2467_s12 = scalar_lea.hbm %s2847_s14, 1024  ;;  %s2471_s26 = scalar_lea.hbm %s2898_s5, 2048 }
 0x27f   : > { %p2468_p1 = scmp.ne.s32.totalorder %s2847_s14, %s2467_s12  ;;  %p2472_p11 = scmp.lt.s32.totalorder %s2847_s14, %s2898_s5 }
 0x280   : > { %p2473_p13 = scmp.lt.s32.totalorder %s2471_s26, %s2467_s12 }
 0x281   : > { %p2469_p8 = pnand %p2468_p1, %p2916_p6 }
 0x282   : > { %p2474_p2 = por %p2473_p13, %p2472_p11 }
 0x283   : > { %p2470_p10 = pneg %p2469_p8 }
 0x285   : > { %p2475_p4 = pnand %p2474_p2, %p2470_p10 }
 0x287   : > { %2478 = shalt.err (!%p2475_p4)
}
 0x288   : > { %s2538_s23 = smov 64   ;;  %s2539_s29 = smov 4  }
 0x289   : > { %2124 = dma.vmem_to_hbm [thread:$0]  (%p2916_p6), %s2849_s27, 1024, %s2847_s14, %s1651_s16, %s2538_s23, %s2538_s23, %s2539_s29  }
 0x28a PF: > { %s1679_s13 = sand.u32 1, %s2513_s18   ;;  %p2917_p12 = scmp.ne.s32.totalorder %s2904_s25, 0 }
 0x28b   : > { %p2918_p0 = scmp.ge.s32.totalorder %s2525_s21, 2  ;;  %s1680_s28 = scalar_lea.sflag [#allocation4], %s1679_s13 }
 0x28d   : > { %p2141_p5 = pnand %p2918_p0, %p2917_p12 }
 0x28f   : > { %p2142_p3 = pneg %p2141_p5 }
 0x291   : > { %2508 = dma.done.wait (%p2142_p3), %s1680_s28, 1024  }
 0x292   : > { %2510 = vsyncadd (%p2142_p3), %s1680_s28, 4294966272  ;;  %p20_p7 = scmp.ge.s32.totalorder %s2650_s6, 4   ;;  %s2919_s18 = smov %s2517_s19 }
 0x293   : > { %s2920_s19 = smov %s2521_s20  ;;  %s2921_s20 = smov %s2660_s10 }
 0x294   : > { %s2922_s21 = smov %s2650_s6  ;;  %22 = sbr.rel (!%p20_p7) target bundleno = 7 (0x7), region = 97 }
 0x299   :  { %1685 = vsyncpa [#allocation3], 1 }
 0x29a   :  { %1687 = vsyncpa [#allocation3 + $0x1], 1 }
 0x29b   :  { %1688 = vsyncpa [#allocation6], 1 }
 0x29c   :  { %1689 = vsyncpa [#allocation9], 1 }
 0x29d   :  { %1690 = vsyncpa [#allocation4], 1 }
 0x29e   :  { %1692 = vsyncpa [#allocation4 + $0x1], 1 }

</bundles_post_ra>
